<compile_context>
chip_gen: v7x
topology: tpu7x:2x2x1
jax: 0.10.0
libtpu: 0.0.40
codegen_flags: <defaults>
</compile_context>

<pallas_src>
import functools

import jax
import jax.numpy as jnp
from jax.experimental import pallas as pl
from jax.experimental.pallas import tpu as pltpu


# ~6 MiB of f32-equivalent elements per input block (double-buffered input +
# f32 temporaries + output blocks stays ~15-25 MiB, inside every generation's
# scoped VMEM once the limit below is applied).
_TARGET_BLOCK_ELEMS = (6 * 1024 * 1024) // 4
# > v5e's 16 MiB / v6e-v7x's 32 MiB defaults, < v7x's 64 MiB physical VMEM.
_VMEM_LIMIT_BYTES = 48 * 1024 * 1024


def _round_up(a, b):
    return ((a + b - 1) // b) * b


def _sublane_pack(dtype):
    # Native sublane packing of the (8, 128) vreg tile for this dtype:
    # f32 -> 8 rows, bf16/f16 -> 16, int8/fp8 -> 32.
    isz = jnp.dtype(dtype).itemsize
    return 8 * max(1, 4 // max(1, isz))


def _fiber_reduce_kernel(x_ref, o_ref, *, method, n_theta):
    """Reduce the theta axis (axis 1 of the squeezed block) in one shot.

    x_ref: (1, tc, T, thw)   or (1, tc, T, th, W)
    o_ref: (1, tc, thw)      or (1, tc, th, W)
    """
    x = x_ref[0]
    if method == "max":
        # max is exact in the native dtype; no f32 staging needed.
        o_ref[0] = jnp.max(x, axis=1).astype(o_ref.dtype)
    else:  # mean: f32 accumulation, one 1/T scale, one cast.
        s = jnp.sum(x.astype(jnp.float32), axis=1)
        o_ref[0] = (s * (1.0 / n_theta)).astype(o_ref.dtype)


def se2_to_r2_projection(x, method="mean"):
    """Pallas equivalent of SE2ToR2Projection.forward.

    x: (B, C, n_theta, H, W)  ->  (B, C, H, W)
    """
    if method not in ("mean", "max"):
        raise Exception("Fiber pooling method not known")

    B, C, T, H, W = x.shape
    HW = H * W
    dtype = x.dtype
    isz = jnp.dtype(dtype).itemsize
    pack = _sublane_pack(dtype)
    pad_t = _round_up(T, pack)  # sublane-padded theta rows in VMEM

    cost = pl.CostEstimate(
        flops=B * C * T * HW,
        transcendentals=0,
        bytes_accessed=(B * C * T * HW + B * C * HW) * isz,
    )
    kernel = functools.partial(_fiber_reduce_kernel, method=method, n_theta=T)

    if HW % 128 == 0:
        # ---------------- Main path: lane-dense flattened spatial axis ------
        # Channel tile: full C (== full dim) or a multiple of the output's
        # sublane packing (ragged trailing channel block is fine).
        tc = C if C <= pack else pack

        # Lane tile: largest multiple of 128 within the element budget.
        max_thw = max(128, (_TARGET_BLOCK_ELEMS // max(1, tc * pad_t)) // 128 * 128)
        thw = min(HW, max_thw)

        # If one block already covers the whole spatial extent, spend the
        # remaining budget on more channels per block.
        if thw >= HW and C > tc:
            tc_fit = (_TARGET_BLOCK_ELEMS // max(1, pad_t * thw)) // pack * pack
            tc = max(pack, min(tc_fit, (C // pack) * pack))

        n_c = pl.cdiv(C, tc)
        n_hw = pl.cdiv(HW, thw)

        # v7x: keep >= 2 "parallel" grid iterations so both TensorCores work.
        if B * n_c * n_hw < 2:
            if HW >= 256:
                thw = max(128, _round_up(HW // 2, 128))
                n_hw = pl.cdiv(HW, thw)
            elif C > pack:
                tc = max(pack, ((C // 2) // pack) * pack)
                n_c = pl.cdiv(C, tc)

        xr = x.reshape(B, C, T, HW)  # free view
        out = pl.pallas_call(
            kernel,
            out_shape=jax.ShapeDtypeStruct((B, C, HW), dtype),
            grid=(B, n_c, n_hw),
            in_specs=[
                pl.BlockSpec((1, tc, T, thw), lambda b, ci, hwi: (b, ci, 0, hwi))
            ],
            out_specs=pl.BlockSpec((1, tc, thw), lambda b, ci, hwi: (b, ci, hwi)),
            compiler_params=pltpu.CompilerParams(
                dimension_semantics=("parallel", "parallel", "parallel"),
                vmem_limit_bytes=_VMEM_LIMIT_BYTES,
            ),
            cost_estimate=cost,
        )(xr)
        return out.reshape(B, C, H, W)

    # ---------------- Fallback: HW not a multiple of 128 --------------------
    # Keep the 5-D layout and tile H (W is the lane axis; W < 128 only costs
    # partial lane occupancy).  Block size stays bounded regardless of T*H*W.
    # TODO(synk): for extremely large W the minimum block (tc=1, th=pack) may
    # still exceed the VMEM limit; such shapes would need W-tiling as well.
    pad_w = _round_up(W, 128)
    tc = min(C, 8)

    max_th = max(1, _TARGET_BLOCK_ELEMS // max(1, tc * T * pad_w))
    if H <= pack or max_th >= H:
        th = H  # equals the full dim -> always a legal block shape
    else:
        th = max(pack, (min(max_th, H) // pack) * pack)

    if th == H and C > tc:
        th_pad = _round_up(th, pack)
        tc_fit = max(1, _TARGET_BLOCK_ELEMS // max(1, T * th_pad * pad_w))
        tc = min(C, max(tc, tc_fit))  # tc is a major dim here: no alignment need

    n_c = pl.cdiv(C, tc)
    n_h = pl.cdiv(H, th)

    # v7x: keep >= 2 parallel iterations (tc has no layout constraint here).
    if B * n_c * n_h < 2 and C >= 2:
        tc = (C + 1) // 2
        n_c = pl.cdiv(C, tc)

    out = pl.pallas_call(
        kernel,
        out_shape=jax.ShapeDtypeStruct((B, C, H, W), dtype),
        grid=(B, n_c, n_h),
        in_specs=[
            pl.BlockSpec((1, tc, T, th, W), lambda b, ci, hi: (b, ci, 0, hi, 0))
        ],
        out_specs=pl.BlockSpec((1, tc, th, W), lambda b, ci, hi: (b, ci, hi, 0)),
        compiler_params=pltpu.CompilerParams(
            dimension_semantics=("parallel", "parallel", "parallel"),
            vmem_limit_bytes=_VMEM_LIMIT_BYTES,
        ),
        cost_estimate=cost,
    )(x)
    return out


if __name__ == "__main__":
    key = jax.random.PRNGKey(0)

    # --- Main path (HW multiple of 128), float32, mean & max ---
    B, C, T, H, W = 2, 4, 8, 16, 16
    x = jax.random.normal(key, (B, C, T, H, W), dtype=jnp.float32)

    y_mean = jax.block_until_ready(se2_to_r2_projection(x, method="mean"))
    assert y_mean.shape == (B, C, H, W)
    assert jnp.allclose(y_mean, jnp.mean(x, axis=2), atol=1e-5, rtol=1e-5)

    y_max = jax.block_until_ready(se2_to_r2_projection(x, method="max"))
    assert y_max.shape == (B, C, H, W)
    assert jnp.allclose(y_max, jnp.max(x, axis=2), atol=1e-6, rtol=1e-6)

    # --- Fallback path (HW not a multiple of 128), float32 ---
    Hf, Wf = 9, 14
    xf = jax.random.normal(jax.random.PRNGKey(1), (B, C, T, Hf, Wf), dtype=jnp.float32)

    yf_mean = jax.block_until_ready(se2_to_r2_projection(xf, method="mean"))
    assert yf_mean.shape == (B, C, Hf, Wf)
    assert jnp.allclose(yf_mean, jnp.mean(xf, axis=2), atol=1e-5, rtol=1e-5)

    yf_max = jax.block_until_ready(se2_to_r2_projection(xf, method="max"))
    assert jnp.allclose(yf_max, jnp.max(xf, axis=2), atol=1e-6, rtol=1e-6)

    # --- bfloat16, max (exact), exercises dtype-aware tiling ---
    xb = jax.random.normal(jax.random.PRNGKey(2), (B, C, T, H, W)).astype(jnp.bfloat16)
    yb_max = jax.block_until_ready(se2_to_r2_projection(xb, method="max"))
    assert jnp.array_equal(yb_max, jnp.max(xb, axis=2))

    print("KERNEL_OK")
</pallas_src>

<mosaic_0001>
module attributes {stable_mosaic.version = 11 : i64} {
  func.func @_fiber_reduce_kernel(%arg0: i32, %arg1: i32, %arg2: i32, %arg3: memref<1x4x8x256xf32, #tpu.memory_space<vmem>>, %arg4: memref<1x4x256xf32, #tpu.memory_space<vmem>>) attributes {dimension_semantics = [#tpu.dimension_semantics<parallel>, #tpu.dimension_semantics<parallel>, #tpu.dimension_semantics<parallel>], iteration_bounds = array<i64: 2, 1, 1>, scalar_prefetch = 0 : i64, scratch_operands = 0 : i64, tpu.core_type = #tpu.core_type<tc>, window_params = [{transform_indices = @transform_0, window_bounds = array<i64: 1, 4, 8, 256>}, {transform_indices = @transform_1, window_bounds = array<i64: 1, 4, 256>}]} {
    %c0 = arith.constant 0 : index
    %c0_0 = arith.constant 0 : index
    %c0_1 = arith.constant 0 : index
    %c0_2 = arith.constant 0 : index
    %0 = vector.load %arg3[%c0, %c0_0, %c0_1, %c0_2] : memref<1x4x8x256xf32, #tpu.memory_space<vmem>>, vector<1x4x8x256xf32>
    %1 = vector.shape_cast %0 : vector<1x4x8x256xf32> to vector<4x8x256xf32>
    %cst = arith.constant dense<0.000000e+00> : vector<4x256xf32>
    %2 = vector.multi_reduction <add>, %1, %cst [1] : vector<4x8x256xf32> to vector<4x256xf32>
    %cst_3 = arith.constant 1.250000e-01 : f32
    %3 = vector.broadcast %cst_3 : f32 to vector<4x256xf32>
    %4 = arith.mulf %2, %3 : vector<4x256xf32>
    %c0_4 = arith.constant 0 : index
    %c0_5 = arith.constant 0 : index
    %c0_6 = arith.constant 0 : index
    %5 = vector.load %arg4[%c0_4, %c0_5, %c0_6] : memref<1x4x256xf32, #tpu.memory_space<vmem>>, vector<1x4x256xf32>
    %6 = vector.shape_cast %5 : vector<1x4x256xf32> to vector<4x256xf32>
    %7 = vector.shape_cast %4 : vector<4x256xf32> to vector<1x4x256xf32>
    tpu.vector_store %arg4[%c0_4, %c0_5, %c0_6], %7 {strides = array<i32>} : memref<1x4x256xf32, #tpu.memory_space<vmem>>, vector<1x4x256xf32>,
    return
  }
  func.func @transform_0(%arg0: i32, %arg1: i32, %arg2: i32) -> (i32, i32, i32, i32) {
    %c0_i32 = arith.constant 0 : i32
    %c0_i32_0 = arith.constant 0 : i32
    return %arg0, %arg1, %c0_i32, %arg2 : i32, i32, i32, i32
  }
  func.func @transform_1(%arg0: i32, %arg1: i32, %arg2: i32) -> (i32, i32, i32) {
    %c0_i32 = arith.constant 0 : i32
    return %arg0, %arg1, %arg2 : i32, i32, i32
  }
}

</mosaic_0001>

<bundles_post_ra>
// kernel: tpu_custom_call.1
= control target key start
LH: loop header
LB: loop body
LE: loop exit
PB: predicated region body
PF: predicated region fallthrough
CT: control target
= control target key end

     0   :  { %6 = vsyncpa [#allocation3], 0  ;;  %s756_s0 = inlined_call_operand.hbm [shape: f32[2,4,8,256], index: 0, kind: input, shape index: {}]   ;;  %s757_s1 = inlined_call_operand.hbm [shape: f32[2,4,256], index: 1, kind: output, shape index: {}]  }
   0x1   :  { %8 = vsyncpa [#allocation3 + $0x1], 0 }
   0x2   :  { %9 = vsyncpa [#allocation4], 0 }
   0x3   :  { %11 = vsyncpa [#allocation4 + $0x1], 0  ;;  %s582_s6 = smov 0   ;;  %s584_s7 = smov 0  }
   0x4   :  { %s586_s8 = smov 0   ;;  %s588_s9 = smov 0  }
   0x5   :  { %s590_s10 = smov 0   ;;  %s592_s11 = smov 0  }
   0x6 LB: > { %s373_s12 = sadd.s32 4294967295, %s566_s11   ;;  %s374_s13 = sadd.s32 4294967294, %s566_s11   ;;  %s566_s11 = sphi %s592_s11, %s17_s11   ;;  %s562_s10 = sphi %s590_s10, %s772_s10   ;;  %s558_s9 = sphi %s588_s9, %s771_s9   ;;  %s554_s8 = sphi %s586_s8, %s770_s8   ;;  %s550_s7 = sphi %s584_s7, %s769_s7   ;;  %s546_s6 = sphi %s582_s6, %s768_s6  }
   0x7   : > { %s36_s14 = sadd.s32 1, %s562_s10  ;;  %s47_s15 = sadd.s32 1, %s554_s8 }
   0x8   : > { %p38_p0 = scmp.ge.s32.totalorder %s36_s14, 2  ;;  %p54_p1 = scmp.ne.s32.totalorder %s554_s8, %s550_s7 }
   0x9   : > { %p55_p2 = scmp.eq.s32.totalorder %s566_s11, 0  ;;  %p60_p3 = scmp.ne.s32.totalorder %s550_s7, %s546_s6 }
   0xa   : > { %s774_s14 = smov (%p38_p0, %s36_s14), 0  ;;  %p61_p5 = scmp.eq.s32.totalorder %s373_s12, 0 }
   0xb   : > { %p623_p4 = por %p55_p2, %p54_p1  ;;  %s40_s17 = ssub.s32 %s562_s10, %s774_s14 }
   0xc   : > { %p88_p6 = scmp.eq.s32.totalorder %s373_s12, 1  ;;  %p45_p7 = scmp.eq.s32.totalorder %s40_s17, 0 }
   0xd   : > { %p629_p8 = por %p61_p5, %p60_p3  ;;  %p94_p10 = scmp.eq.s32.totalorder %s374_s13, 1 }
   0xe   : > { %p633_p9 = por %p88_p6, %p54_p1  ;;  %p402_p13 = scmp.lt.s32.totalorder %s566_s11, 2 }
   0xf   : > { %s638_s20 = scalar_select %p45_p7, %s554_s8, %s47_s15  }
  0x10   : > { %s761_s19 = scalar_select %p633_p9, 1, 0 }
  0x11   : > { %p640_p11 = por %p94_p10, %p60_p3  ;;  %s114_s22 = sand.u32 1, %s554_s8  }
  0x12   : > { %s377_s23 = sshll.u32 %s114_s22, 6  ;;  %s388_s24 = sshll.u32 %s562_s10, 10 }
  0x13   : > { %s762_s21 = scalar_select %p640_p11, 1, 0 }
  0x14   : > { %s651_s27 = scalar_lea.hbm %s756_s0, %s388_s24  ;;  %s118_s28 = scalar_lea.vmem [#allocation2], %s377_s23 }
  0x15   : > { %s130_s29 = sshll.u32 %s118_s28, 4  ;;  %p657_p0 = pnand %p402_p13, %p623_p4  ;;  %s653_s29 = int_to_ptr.vmem [resolvable:$true] %s130_s29 }
  0x16   : > { %s662_s2 = scalar_lea.sflag [#allocation3], %s114_s22  ;;  %s454_s3 = scalar_lea.hbm %s651_s27, 1024 }
  0x17   : > { %p455_p2 = scmp.ne.s32.totalorder %s651_s27, %s454_s3  ;;  %p456_p3 = pneg %p657_p0 }
  0x18   : > { %s459_s12 = scalar_lea.hbm %s756_s0, 2048  ;;  %p460_p4 = scmp.lt.u32.totalorder %s651_s27, %s756_s0 }
  0x19   : > { %p457_p5 = pnand %p456_p3, %p455_p2  ;;  %p461_p7 = scmp.lt.u32.totalorder %s459_s12, %s454_s3 }
  0x1a   : > { %p463_p13 = scmp.lt.u32.totalorder %s454_s3, %s651_s27 }
  0x1b   : > { %p458_p6 = pneg %p457_p5  ;;  %p462_p10 = por %p461_p7, %p460_p4 }
  0x1d   : > { %p464_p12 = por %p463_p13, %p462_p10 }
  0x1f   : > { %p465_p1 = pnand %p464_p12, %p458_p6 }
  0x21   : > { %468 = shalt.err (!%p465_p1)
}
  0x22   : > { %s469_s16 = scalar_lea.vmem %s653_s29, 1024  ;;  %s568_s17 = smov [#allocation2]  }
  0x23   : > { %p470_p2 = scmp.ne.s32.totalorder %s653_s29, %s469_s16  ;;  %s474_s22 = sshll.u32 %s568_s17, 4  ;;  %s475_s22 = int_to_ptr.vmem [resolvable:$false] %s474_s22 }
  0x24   : > { %s476_s23 = scalar_lea.vmem %s475_s22, 2048  ;;  %p477_p9 = scmp.lt.s32.totalorder %s653_s29, %s475_s22 }
  0x25   : > { %p472_p5 = pnand %p470_p2, %p456_p3  ;;  %p478_p4 = scmp.lt.s32.totalorder %s476_s23, %s469_s16 }
  0x27   : > { %p473_p11 = pneg %p472_p5  ;;  %p479_p7 = por %p478_p4, %p477_p9 }
  0x29   : > { %p480_p10 = pnand %p479_p7, %p473_p11 }
  0x2b   : > { %483 = shalt.err (!%p480_p10)
}
  0x2c   : > { %s569_s24 = smov 256   ;;  %s570_s25 = smov 16  }
  0x2d   : > { %397 = dma.hbm_to_vmem [thread:$0]  (!%p657_p0), %s651_s27, 1024, %s653_s29, %s662_s2, %s569_s24, %s569_s24, %s570_s25  }
  0x2e   : > { %p138_p12 = scmp.lt.s32.totalorder %s566_s11, 3  ;;  %p764_p1 = scmp.ge.s32.totalorder %s566_s11, 1 }
  0x30   : > { %p139_p3 = pnand %p764_p1, %p138_p12 }
  0x31   : > { %s694_s26 = sand.u32 (!%p139_p3), 1, %s550_s7  }
  0x32   : > { %142 = sbr.rel (%p139_p3) target bundleno = 98 (0x62), region = 24  ;;  %s381_s28 = sshll.u32 (!%p139_p3), %s694_s26, 6 }
  0x33   : > { %s145_s3 = scalar_lea.sflag (!%p139_p3), [#allocation3], %s694_s26  ;;  %s148_s4 = scalar_lea.vmem (!%p139_p3), [#allocation2], %s381_s28 }
  0x39   : > { %537 = dma.done.wait (%p629_p8), %s145_s3, 1024  }
  0x3a   : > { %539 = vsyncadd (%p629_p8), %s145_s3, 4294966272  ;;  %v170_v0 = vld [vmem:[%s148_s4] sm:$0xff]  ;;  %v171_v1 = vld [vmem:[%s148_s4 + $0x8] sm:$0xff]  ;;  %s382_s18 = sshll.u32 %s694_s26, 3  ;;  %vm247_vm0 = vcmask 1041409   ;;  %vm249_vm1 = vcmask 1045509  }
  0x3b   : > { %v172_v2 = vld [vmem:[%s148_s4 + $0x10] sm:$0xff]  ;;  %v173_v3 = vld [vmem:[%s148_s4 + $0x18] sm:$0xff]  ;;  %v174_v4 = vld [vmem:[%s148_s4 + $0x20] sm:$0xff]  ;;  %v178_v6 = vrot.slane %v170_v0, 4  ;;  %v184_v7 = vrot.slane %v171_v1, 4  ;;  %vm252_vm2 = vcmask 1042434  }
  0x3c   : > { %v175_v5 = vld [vmem:[%s148_s4 + $0x28] sm:$0xff]  ;;  %v190_v8 = vrot.slane %v172_v2, 4  ;;  %v176_v9 = vld [vmem:[%s148_s4 + $0x30] sm:$0xff]  ;;  %v177_v10 = vld [vmem:[%s148_s4 + $0x38] sm:$0xff]  ;;  %v196_v11 = vrot.slane %v173_v3, 4  ;;  %v202_v12 = vrot.slane %v174_v4, 4 }
  0x3d   : > { %v208_v13 = vrot.slane %v175_v5, 4  ;;  %v179_v14 = vadd.f32 %v178_v6, %v170_v0  ;;  %v185_v15 = vadd.f32 %v184_v7, %v171_v1  ;;  %v214_v17 = vrot.slane %v176_v9, 4  ;;  %s166_s27 = scalar_lea.vmem [#allocation5], %s382_s18  ;;  %s389_s30 = sshll.u32 %s558_s9, 7 }
  0x3e   : > { %v191_v16 = vadd.f32 %v190_v8, %v172_v2  ;;  %v197_v18 = vadd.f32 %v196_v11, %v173_v3  ;;  %v203_v19 = vadd.f32 %v202_v12, %v174_v4  ;;  %v220_v21 = vrot.slane %v177_v10, 4  ;;  %s282_s29 = sshll.u32 %s166_s27, 4  ;;  %s709_s12 = scalar_lea.hbm %s757_s1, %s389_s30  ;;  %s704_s29 = int_to_ptr.vmem [resolvable:$true] %s282_s29 }
  0x3f   : > { %v209_v20 = vadd.f32 %v208_v13, %v175_v5  ;;  %v180_v22 = vrot.slane %v179_v14, 2  ;;  %v186_v23 = vrot.slane %v185_v15, 2  ;;  %v215_v25 = vadd.f32 %v214_v17, %v176_v9  ;;  %s264_s13 = scalar_lea.sflag [#allocation4], %s694_s26  ;;  %s484_s15 = scalar_lea.vmem %s704_s29, 128 }
  0x40   : > { %v192_v24 = vrot.slane %v191_v16, 2  ;;  %v198_v26 = vrot.slane %v197_v18, 2  ;;  %v204_v27 = vrot.slane %v203_v19, 2  ;;  %v221_v29 = vadd.f32 %v220_v21, %v177_v10  ;;  %p485_p8 = scmp.ne.s32.totalorder %s704_s29, %s484_s15  ;;  %p765_p9 = scmp.ne.s32.totalorder %s761_s19, 0 }
  0x41   : > { %v210_v28 = vrot.slane %v209_v20, 2  ;;  %v181_v30 = vadd.f32 %v180_v22, %v179_v14  ;;  %v187_v31 = vadd.f32 %v186_v23, %v185_v15  ;;  %v216_v33 = vrot.slane %v215_v25, 2  ;;  %s571_s9 = smov [#allocation5]  }
  0x42   : > { %v193_v32 = vadd.f32 %v192_v24, %v191_v16  ;;  %v199_v34 = vadd.f32 %v198_v26, %v197_v18  ;;  %v205_v35 = vadd.f32 %v204_v27, %v203_v19  ;;  %v222_v37 = vrot.slane %v221_v29, 2  ;;  %p486_p11 = pnand %p485_p8, %p765_p9  ;;  %s488_s16 = sshll.u32 %s571_s9, 4  ;;  %s489_s16 = int_to_ptr.vmem [resolvable:$false] %s488_s16 }
  0x43   : > { %v211_v36 = vadd.f32 %v210_v28, %v209_v20  ;;  %v182_v38 = vrot.slane %v181_v30, 1  ;;  %v188_v39 = vrot.slane %v187_v31, 1  ;;  %v217_v41 = vadd.f32 %v216_v33, %v215_v25  ;;  %s490_s17 = scalar_lea.vmem %s489_s16, 256  ;;  %p491_p6 = scmp.lt.s32.totalorder %s704_s29, %s489_s16 }
  0x44   : > { %v194_v40 = vrot.slane %v193_v32, 1  ;;  %v200_v42 = vrot.slane %v199_v34, 1  ;;  %v206_v43 = vrot.slane %v205_v35, 1  ;;  %v223_v45 = vadd.f32 %v222_v37, %v221_v29  ;;  %p487_p0 = pneg %p486_p11  ;;  %p492_p13 = scmp.lt.s32.totalorder %s490_s17, %s484_s15 }
  0x45   : > { %v212_v44 = vrot.slane %v211_v36, 1  ;;  %v183_v46 = vadd.f32 %v182_v38, %v181_v30  ;;  %v189_v47 = vadd.f32 %v188_v39, %v187_v31  ;;  %v218_v49 = vrot.slane %v217_v41, 1 }
  0x46   : > { %v195_v48 = vadd.f32 %v194_v40, %v193_v32  ;;  %v201_v50 = vadd.f32 %v200_v42, %v199_v34  ;;  %v207_v51 = vadd.f32 %v206_v43, %v205_v35  ;;  %v224_v53 = vrot.slane %v223_v45, 1  ;;  %p493_p2 = por %p492_p13, %p491_p6 }
  0x47   : > { %v213_v52 = vadd.f32 %v212_v44, %v211_v36  ;;  %v219_v54 = vadd.f32 %v218_v49, %v217_v41  ;;  %v226_v55 = vmul.f32 0.125, %v183_v46  ;;  %v227_v56 = vmul.f32 0.125, %v189_v47 }
  0x48   : > { %v228_v57 = vmul.f32 0.125, %v195_v48  ;;  %v225_v58 = vadd.f32 %v224_v53, %v223_v45  ;;  %v229_v59 = vmul.f32 0.125, %v201_v50  ;;  %v230_v60 = vmul.f32 0.125, %v207_v51  ;;  %p494_p5 = pnand %p493_p2, %p487_p0 }
  0x49   : > { %v231_v61 = vmul.f32 0.125, %v213_v52  ;;  %v232_v62 = vmul.f32 0.125, %v219_v54  ;;  %v242_v0 = vcombine.low %v226_v55, %v227_v56  ;;  %vm254_vm3 = vcmask 1046534  }
  0x4a   : > { %v233_v63 = vmul.f32 0.125, %v225_v58  ;;  %v243_v1 = vcombine.low %v228_v57, %v229_v59  ;;  %vm257_vm4 = vcmask 1043459   ;;  %vm259_vm5 = vcmask 1047559  }
  0x4b   : > { %v244_v2 = vcombine.low %v230_v60, %v231_v61 }
  0x4c   : > { %v245_v3 = vcombine.low %v232_v62, %v233_v63  ;;  %v246_v4 = vrot.slane %v243_v1, 7 }
  0x4d   : > { %v251_v5 = vrot.slane %v244_v2, 6 }
  0x4e   : > { %v248_v6 = vsel %vm247_vm0, %v246_v4, %v242_v0  ;;  %v256_v7 = vrot.slane %v245_v3, 5 }
  0x4f   : > { %v250_v8 = vsel %vm249_vm1, %v246_v4, %v248_v6 }
  0x50   : > { %v253_v9 = vsel %vm252_vm2, %v251_v5, %v250_v8 }
  0x51   : > { %v255_v10 = vsel %vm254_vm3, %v251_v5, %v253_v9 }
  0x52   : > { %v258_v11 = vsel %vm257_vm4, %v256_v7, %v255_v10 }
  0x53   : > { %v260_v12 = vsel %vm259_vm5, %v256_v7, %v258_v11 }
  0x54   : > { %262 = vst [vmem:[%s166_s27] sm:$0xff] %v260_v12 }
  0x55   : > { %497 = shalt.err (!%p494_p5)
}
  0x56   : > { %s498_s22 = scalar_lea.hbm %s709_s12, 128  ;;  %s502_s25 = scalar_lea.hbm %s757_s1, 256 }
  0x57   : > { %p499_p4 = scmp.ne.s32.totalorder %s709_s12, %s498_s22  ;;  %p503_p12 = scmp.lt.u32.totalorder %s709_s12, %s757_s1 }
  0x58   : > { %p504_p1 = scmp.lt.u32.totalorder %s502_s25, %s498_s22  ;;  %p506_p8 = scmp.lt.u32.totalorder %s498_s22, %s709_s12 }
  0x59   : > { %p500_p7 = pnand %p499_p4, %p765_p9 }
  0x5a   : > { %p505_p3 = por %p504_p1, %p503_p12 }
  0x5b   : > { %p501_p10 = pneg %p500_p7 }
  0x5c   : > { %p507_p11 = por %p506_p8, %p505_p3 }
  0x5e   : > { %p508_p0 = pnand %p507_p11, %p501_p10 }
  0x60   : > { %511 = shalt.err (!%p508_p0)
}
  0x61   : > { %392 = dma.vmem_to_hbm [thread:$0]  (%p765_p9), %s704_s29, 128, %s709_s12, %s264_s13  }
  0x62 PF: > { %s294_s3 = sand.u32 1, %s546_s6   ;;  %p766_p6 = scmp.ne.s32.totalorder %s762_s21, 0 }
  0x63   : > { %p767_p13 = scmp.ge.s32.totalorder %s566_s11, 2  ;;  %s295_s4 = scalar_lea.sflag [#allocation4], %s294_s3 }
  0x65   : > { %p399_p2 = pnand %p767_p13, %p766_p6 }
  0x67   : > { %541 = dma.done.wait (!%p399_p2), %s295_s4, 128  }
  0x68   : > { %543 = vsyncadd (!%p399_p2), %s295_s4, 4294967168  ;;  %s17_s11 = sadd.s32 1, %s566_s11   ;;  %s768_s6 = smov %s550_s7 }
  0x69   : > { %p14_p5 = scmp.ge.s32.totalorder %s17_s11, 4   ;;  %s769_s7 = smov %s554_s8 }
  0x6a   : > { %s770_s8 = smov %s638_s20  ;;  %s771_s9 = smov %s562_s10 }
  0x6b   : > { %s772_s10 = smov %s774_s14  ;;  %16 = sbr.rel (!%p14_p5) target bundleno = 6 (0x6), region = 69 }
  0x72   :  { %300 = vsyncpa [#allocation3], 1 }
  0x73   :  { %302 = vsyncpa [#allocation3 + $0x1], 1 }
  0x74   :  { %303 = vsyncpa [#allocation4], 1 }
  0x75   :  { %305 = vsyncpa [#allocation4 + $0x1], 1 }

</bundles_post_ra>
